<compile_context>
chip_gen: v6e
topology: v6e:2x2x1
jax: 0.10.0
libtpu: 0.0.40
codegen_flags: <defaults>
</compile_context>

<pallas_src>
import functools
import math

import jax
import jax.numpy as jnp
from jax import lax
from jax.experimental import pallas as pl
from jax.experimental.pallas import tpu as pltpu

LANE = 128


def _round_up(x, m):
    return ((x + m - 1) // m) * m


def _vmem_capacity_bytes():
    """Physical per-core VMEM; conservative (v7x) fallback if the query fails."""
    try:
        cap = int(getattr(pltpu.get_tpu_info(), "vmem_capacity_bytes", 0))
        if cap > 0:
            return cap
    except Exception:
        pass
    return 64 * 1024 * 1024          # v7x per-TensorCore size (most restrictive)


# ----------------------------------------------------------------------------
# STE.forward (per-tensor fake quantization), single-block Pallas kernel on the
# weight already in (K*K*Cin, Cout) conv layout.  Writes the padded bf16 MXU
# operand directly (zeroing the Cout padding tail in-kernel).
# ----------------------------------------------------------------------------
def _quant_kernel(w_ref, o_ref, *, step, symmetric, c_out):
    w = w_ref[...]
    mask = (w != 0.0).astype(w.dtype)              # matches `weight_mask = w != 0`
    if symmetric:
        scale = jnp.max(jnp.abs(w))
        safe = jnp.where(scale == 0.0, 1.0, scale)         # guard /0: all-zero w
        wq = scale * (jnp.round(w / safe * step) / step)
    else:
        wmin = jnp.min(w)
        alpha = jnp.max(w) - wmin
        safe = jnp.where(alpha == 0.0, 1.0, alpha)          # guard /0: constant w
        wq = alpha * (jnp.round((w - wmin) / safe * step) / step) + wmin
    wq = wq * mask
    if o_ref.shape[-1] > c_out:                    # zero the Cout padding tail
        o_ref[...] = jnp.zeros_like(o_ref)
    o_ref[:, :c_out] = wq.astype(o_ref.dtype)


def quantize_weight_flat(w_flat, nbits, symmetric, c_out_pad, vmem_limit):
    """STE.forward on (K*K*Cin, Cout) f32 -> padded bf16 (K*K*Cin, Cout_pad)."""
    kkc, c_out = w_flat.shape
    if nbits == 0:
        return jnp.zeros((kkc, c_out_pad), jnp.bfloat16)
    if nbits is None:                              # no quantization, pad + cast
        return jnp.pad(w_flat.astype(jnp.bfloat16),
                       ((0, 0), (0, c_out_pad - c_out)))
    step = float(2 ** nbits - 1)                   # PyTorch STE: 2**bit - 1 (both modes)
    return pl.pallas_call(
        functools.partial(_quant_kernel, step=step, symmetric=symmetric,
                          c_out=c_out),
        out_shape=jax.ShapeDtypeStruct((kkc, c_out_pad), jnp.bfloat16),
        compiler_params=pltpu.CompilerParams(vmem_limit_bytes=int(vmem_limit)),
    )(w_flat)


# ----------------------------------------------------------------------------
# Conv2d forward kernel.  grid = (Cout-tiles, N, H-tiles).  Per step: one
# halo'd input row-tile is live in a manually double-buffered VMEM scratch
# (the DMA chain runs over the flattened (image, h-tile) sequence, so every
# tile after the first is prefetched, including across image boundaries), and
# the tile is contracted against one Cout-tile of the weight on the MXU.
# ----------------------------------------------------------------------------
def _conv_kernel(x_hbm, w_ref, o_ref, xbuf, sem, *,
                 K, stride, TH, W_out, Hp, nh, n_imgs, c_in, im2col):
    # x_hbm : (N*Hp, Wp, Cin)   bf16, raw HBM (manual DMA)
    # w_ref : (K*K*Cin, cout_tile) bf16 VMEM block (single-buffered)
    # o_ref : (TH*W_out, cout_tile) bf16 output block
    # xbuf  : (2, TH_in, Wp, Cin) bf16 double buffer ; sem : 2 DMA semaphores
    n = pl.program_id(1)
    t = pl.program_id(2)
    th_in = (TH - 1) * stride + K
    n_tiles = n_imgs * nh
    g = n * nh + t                       # flat (image, h-tile) index
    slot = g % 2

    def tile_copy(g_idx, slot_idx):
        row0 = (g_idx // nh) * Hp + (g_idx % nh) * (TH * stride)
        return pltpu.make_async_copy(
            x_hbm.at[pl.ds(row0, th_in)], xbuf.at[slot_idx], sem.at[slot_idx])

    # Cold prime only at the first tile of this core's (n, t) sweep; every
    # later tile (including the first tile of each subsequent image) was
    # prefetched by the previous grid step.
    @pl.when(jnp.logical_and(n == 0, t == 0))
    def _():
        tile_copy(g, slot).start()

    @pl.when(g + 1 < n_tiles)            # prefetch next tile (cross-image too)
    def _():
        tile_copy(g + 1, 1 - slot).start()

    tile_copy(g, slot).wait()

    def window(kh, kw):                  # (TH, W_out, Cin) shifted input window
        if stride == 1:
            return xbuf[slot, pl.ds(kh, TH), pl.ds(kw, W_out), :]
        return xbuf[slot, pl.ds(kh, TH, stride), pl.ds(kw, W_out, stride), :]

    if im2col:
        # Small Cin: concatenate the K*K windows along channels -> one deep
        # bf16 MXU matmul instead of K*K shallow Cin-deep dots.
        # TODO(synk): for Cin << 128 a lane-folded (W*Cin) input layout would
        # avoid the lane padding of these windows during the patch build.
        cols = [window(kh, kw) for kh in range(K) for kw in range(K)]
        patch = jnp.concatenate(cols, axis=-1).reshape(TH * W_out, K * K * c_in)
        acc = jnp.dot(patch, w_ref[...], preferred_element_type=jnp.float32)
    else:
        # Cin already at MXU depth: accumulate K*K full-depth dots and skip the
        # patch materialization (less VMEM per tile -> larger TH fits).
        acc = jnp.zeros((TH * W_out, o_ref.shape[-1]), jnp.float32)
        for kh in range(K):
            for kw in range(K):
                wk = w_ref[pl.ds((kh * K + kw) * c_in, c_in), :]
                acc += jnp.dot(window(kh, kw).reshape(TH * W_out, c_in), wk,
                               preferred_element_type=jnp.float32)

    o_ref[...] = acc.astype(o_ref.dtype)      # f32 accumulation, bf16 store


# ----------------------------------------------------------------------------
# Tiling heuristics.
# ----------------------------------------------------------------------------
def _cout_tiling(c_out):
    """Returns (Cout_pad, cout_tile, n_cout_tiles)."""
    if c_out <= LANE:
        return c_out, c_out, 1            # unpadded: block last dim == array dim
    tile = min(256, _round_up(c_out, LANE))   # MXU-native width on v6e/v7x
    pad = _round_up(c_out, tile)
    return pad, tile, pad // tile


def _tile_vmem_bytes(TH, Wp, C_in, W_out, K, stride, cout_tile):
    """Conservative per-step VMEM bytes incl. (sublane,128) tile padding."""
    th_in = (TH - 1) * stride + K
    rows = TH * W_out
    lane_cin = _round_up(C_in, LANE)
    lane_co = _round_up(cout_tile, LANE)
    b = 2 * th_in * _round_up(Wp, 16) * lane_cin * 2          # input double buf (bf16)
    b += 2 * _round_up(rows, 16) * lane_co * 2                # out block, 2 bufs (bf16)
    b += 1 * _round_up(K * K * C_in, 16) * lane_co * 2        # weight, Buffered(1)
    b += _round_up(rows, 8) * lane_co * 4                     # f32 accumulator
    if C_in < LANE:                                           # im2col patch (bf16)
        b += _round_up(rows, 16) * _round_up(K * K * C_in, LANE) * 2
    return b


def _pick_h_tile(H_out, W_out, Wp, C_in, K, stride, cout_tile, budget, h_tile):
    if h_tile is not None:
        assert H_out % h_tile == 0 and (h_tile * W_out) % 8 == 0, \
            "h_tile must divide H_out and keep h_tile*W_out a multiple of 8"
        return h_tile
    cands = [th for th in range(1, H_out + 1)
             if H_out % th == 0 and (th * W_out) % 8 == 0]
    if not cands:
        # TODO(synk): remainder-tile path (pl.when-masked last tile) instead of
        # falling back to a whole-image tile for awkward H_out/W_out.
        cands = [H_out]
    fits = [th for th in cands
            if _tile_vmem_bytes(th, Wp, C_in, W_out, K, stride, cout_tile) <= budget]
    if not fits:
        return min(cands)
    # Prefer TH*W_out a multiple of 256 (amortize MXU fill/drain, full-width vst).
    pref = [th for th in fits if (th * W_out) % 256 == 0]
    return max(pref) if pref else max(fits)


# ----------------------------------------------------------------------------
# Wrapper: FP_Conv.forward.
# ----------------------------------------------------------------------------
def fp_conv2d(x_nchw, w_oihw, *, nbits=None, symmetric=False,
              stride=1, padding=0, h_tile=None):
    """FP_Conv.forward: conv2d(x, STE(w, nbits, symmetric)), no bias."""
    N, C_in, H, W = x_nchw.shape
    C_out, _, K, _ = w_oihw.shape

    cap = _vmem_capacity_bytes()
    vmem_limit = (cap * 13) // 16          # ~52 MiB on v7x, ~104 MiB on v5e/v6e
    budget = max(vmem_limit - (6 << 20), 8 << 20)

    C_out_pad, cout_tile, n_co = _cout_tiling(C_out)

    # --- weight: fake-quantize + pad + bf16-cast in one Pallas pass ---------
    w_flat = jnp.transpose(w_oihw, (2, 3, 1, 0)).reshape(K * K * C_in, C_out)
    w_mx = quantize_weight_flat(w_flat, nbits, symmetric, C_out_pad, vmem_limit)

    # --- input glue: NCHW -> NHWC, zero pad, bf16 cast -----------------------
    # TODO(synk): fold the spatial zero-padding into the in-kernel DMA
    # (zero-fill the VMEM tile, copy valid rows only) and support NHWC
    # end-to-end so these XLA transpose/pad passes disappear.
    Hp, Wp = H + 2 * padding, W + 2 * padding
    H_out = (Hp - K) // stride + 1
    W_out = (Wp - K) // stride + 1
    x = jnp.transpose(x_nchw, (0, 2, 3, 1)).astype(jnp.bfloat16)
    x = jnp.pad(x, ((0, 0), (padding, padding), (padding, padding), (0, 0)))
    x_rows = x.reshape(N * Hp, Wp, C_in)            # flat row view for manual DMA

    TH = _pick_h_tile(H_out, W_out, Wp, C_in, K, stride, cout_tile, budget, h_tile)
    nh = H_out // TH
    TH_in = (TH - 1) * stride + K
    need = _tile_vmem_bytes(TH, Wp, C_in, W_out, K, stride, cout_tile)
    vmem_limit = min(cap, max(vmem_limit, need + (6 << 20)))    # graceful fallback

    kernel = functools.partial(
        _conv_kernel, K=K, stride=stride, TH=TH, W_out=W_out, Hp=Hp, nh=nh,
        n_imgs=N, c_in=C_in, im2col=(C_in < LANE))

    w_index = lambda co, n, t: (0, co)
    try:
        # Constant block index along the inner axes -> no second pipeline buffer.
        w_spec = pl.BlockSpec((K * K * C_in, cout_tile), w_index,
                              pipeline_mode=pl.Buffered(1))
    except (TypeError, AttributeError):
        w_spec = pl.BlockSpec((K * K * C_in, cout_tile), w_index)

    out_flat = pl.pallas_call(
        kernel,
        out_shape=jax.ShapeDtypeStruct((N * H_out * W_out, C_out_pad),
                                       jnp.bfloat16),
        grid=(n_co, N, nh),
        in_specs=[
            pl.BlockSpec(memory_space=pl.ANY),       # raw HBM input, manual DMA
            w_spec,
        ],
        out_specs=pl.BlockSpec((TH * W_out, cout_tile),
                               lambda co, n, t: (n * nh + t, co)),
        scratch_shapes=[
            pltpu.VMEM((2, TH_in, Wp, C_in), jnp.bfloat16),
            pltpu.SemaphoreType.DMA((2,)),
        ],
        compiler_params=pltpu.CompilerParams(
            # Cout tiles are independent -> "parallel" (second megacore axis on
            # v7x); the (image, h-tile) axes carry the manual cross-image DMA
            # prefetch chain -> "arbitrary".
            # TODO(synk): when n_co == 1 and N >= 2, a batch-parallel variant
            # (per-image cold prime, no cross-image prefetch) would restore
            # two-TensorCore occupancy on v7x.
            dimension_semantics=("parallel", "arbitrary", "arbitrary"),
            vmem_limit_bytes=int(vmem_limit),
        ),
    )(x_rows, w_mx)

    out = out_flat[:, :C_out].reshape(N, H_out, W_out, C_out)
    return jnp.transpose(out, (0, 3, 1, 2)).astype(jnp.float32)     # NCHW, f32


# ----------------------------------------------------------------------------
# Self-check.
# ----------------------------------------------------------------------------
def _reference_conv(x, wq_oihw, stride, padding):
    y = lax.conv_general_dilated(
        x.astype(jnp.bfloat16), wq_oihw.astype(jnp.bfloat16),
        (stride, stride), [(padding, padding), (padding, padding)],
        dimension_numbers=("NCHW", "OIHW", "NCHW"),
        preferred_element_type=jnp.float32)
    # The kernel stores bf16; match that rounding for a tight comparison.
    return y.astype(jnp.bfloat16).astype(jnp.float32)


def _check(key, N, C_in, C_out, H, W, K, stride, padding, nbits, symmetric,
           h_tile=None, name=""):
    kx, kw = jax.random.split(key)
    x = jax.random.normal(kx, (N, C_in, H, W), dtype=jnp.float32)
    # FP_Conv weight init: normal(0, sqrt(2/(n+m))), n=K*K*Cout, m=K*K*Cin.
    std = math.sqrt(2.0 / (K * K * C_out + K * K * C_in))
    w = std * jax.random.normal(kw, (C_out, C_in, K, K), dtype=jnp.float32)

    y = fp_conv2d(x, w, nbits=nbits, symmetric=symmetric,
                  stride=stride, padding=padding, h_tile=h_tile)
    y = jax.block_until_ready(y)
    H_out = (H + 2 * padding - K) // stride + 1
    W_out = (W + 2 * padding - K) // stride + 1
    assert y.shape == (N, C_out, H_out, W_out), (name, y.shape)

    # Reference uses exactly the quantized bf16 weights the kernel used.
    c_out_pad, _, _ = _cout_tiling(C_out)
    w_flat = jnp.transpose(w, (2, 3, 1, 0)).reshape(K * K * C_in, C_out)
    wq = quantize_weight_flat(w_flat, nbits, symmetric, c_out_pad, 64 << 20)
    wq = jnp.transpose(wq[:, :C_out].reshape(K, K, C_in, C_out), (3, 2, 0, 1))
    y_ref = _reference_conv(x, wq, stride, padding)
    err = float(jnp.max(jnp.abs(y - y_ref)))
    assert jnp.allclose(y, y_ref, atol=2e-2, rtol=2e-2), (name, err)


if __name__ == "__main__":
    key = jax.random.PRNGKey(0)
    k1, k2 = jax.random.split(key)
    # FP_Conv(4, 8, 3, padding=1, Nbits=4): small-Cin im2col path, UNpadded
    # Cout, 2 H-tiles/image x 2 images -> exercises the cross-image prefetch.
    _check(k1, N=2, C_in=4, C_out=8, H=16, W=16, K=3, stride=1, padding=1,
           nbits=4, symmetric=False, h_tile=8, name="small")
    # Wide layer: Cin >= 128 accumulate path + Cout tiling (2 parallel tiles).
    _check(k2, N=1, C_in=128, C_out=384, H=8, W=8, K=3, stride=1, padding=1,
           nbits=4, symmetric=True, h_tile=None, name="wide")
    print("KERNEL_OK")
</pallas_src>

<mosaic_0001>
module attributes {stable_mosaic.version = 11 : i64} {
  func.func @_quant_kernel(%arg0: memref<36x8xf32, #tpu.memory_space<vmem>>, %arg1: memref<36x8xbf16, #tpu.memory_space<vmem>>) attributes {dimension_semantics = [], scalar_prefetch = 0 : i64, scratch_operands = 0 : i64, tpu.core_type = #tpu.core_type<tc>} {
    %c0 = arith.constant 0 : index
    %c0_0 = arith.constant 0 : index
    %0 = vector.load %arg0[%c0, %c0_0] : memref<36x8xf32, #tpu.memory_space<vmem>>, vector<36x8xf32>
    %cst = arith.constant 0.000000e+00 : f32
    %1 = vector.broadcast %cst : f32 to vector<36x8xf32>
    %2 = arith.cmpf one, %0, %1 : vector<36x8xf32>
    %3 = arith.extui %2 : vector<36x8xi1> to vector<36x8xi32>
    %4 = arith.sitofp %3 : vector<36x8xi32> to vector<36x8xf32>
    %5 = vector.shape_cast %0 : vector<36x8xf32> to vector<1x36x8xf32>
    %cst_1 = arith.constant dense<0x7F800000> : vector<1xf32>
    %6 = vector.multi_reduction <minimumf>, %5, %cst_1 [1, 2] : vector<1x36x8xf32> to vector<1xf32>
    %7 = vector.shape_cast %6 : vector<1xf32> to vector<1x1x1xf32>
    %8 = vector.extract %7[0, 0, 0] : f32 from vector<1x1x1xf32>
    %9 = vector.shape_cast %0 : vector<36x8xf32> to vector<1x36x8xf32>
    %cst_2 = arith.constant dense<0xFF800000> : vector<1xf32>
    %10 = vector.multi_reduction <maximumf>, %9, %cst_2 [1, 2] : vector<1x36x8xf32> to vector<1xf32>
    %11 = vector.shape_cast %10 : vector<1xf32> to vector<1x1x1xf32>
    %12 = vector.extract %11[0, 0, 0] : f32 from vector<1x1x1xf32>
    %13 = arith.subf %12, %8 : f32
    %cst_3 = arith.constant 0.000000e+00 : f32
    %14 = arith.cmpf oeq, %13, %cst_3 : f32
    %cst_4 = arith.constant 1.000000e+00 : f32
    %15 = arith.select %14, %cst_4, %13 : f32
    %16 = vector.broadcast %8 : f32 to vector<36x8xf32>
    %17 = arith.subf %0, %16 : vector<36x8xf32>
    %18 = vector.broadcast %15 : f32 to vector<36x8xf32>
    %19 = arith.divf %17, %18 : vector<36x8xf32>
    %cst_5 = arith.constant 1.500000e+01 : f32
    %20 = vector.broadcast %cst_5 : f32 to vector<36x8xf32>
    %21 = arith.mulf %19, %20 : vector<36x8xf32>
    %22 = math.roundeven %21 : vector<36x8xf32>
    %cst_6 = arith.constant 1.500000e+01 : f32
    %23 = vector.broadcast %cst_6 : f32 to vector<36x8xf32>
    %24 = arith.divf %22, %23 : vector<36x8xf32>
    %25 = vector.broadcast %13 : f32 to vector<36x8xf32>
    %26 = arith.mulf %25, %24 : vector<36x8xf32>
    %27 = vector.broadcast %8 : f32 to vector<36x8xf32>
    %28 = arith.addf %26, %27 : vector<36x8xf32>
    %29 = arith.mulf %28, %4 : vector<36x8xf32>
    %30 = arith.truncf %29 : vector<36x8xf32> to vector<36x8xbf16>
    %c0_7 = arith.constant 0 : index
    %c0_8 = arith.constant 0 : index
    %31 = vector.load %arg1[%c0_7, %c0_8] : memref<36x8xbf16, #tpu.memory_space<vmem>>, vector<36x8xbf16>
    tpu.vector_store %arg1[%c0_7, %c0_8], %30 {strides = array<i32>} : memref<36x8xbf16, #tpu.memory_space<vmem>>, vector<36x8xbf16>,
    return
  }
}

</mosaic_0001>

<bundles_post_ra>
// kernel: tpu_custom_call.1
= control target key start
LH: loop header
LB: loop body
LE: loop exit
PB: predicated region body
PF: predicated region fallthrough
CT: control target
= control target key end

     0   :  { %vm28_vm0 = vcmask 64512   ;;  %vm33_vm1 = vcmask 60416   ;;  %v207_v60 = vmov 0.0   ;;  %vm139_vm12 = vcmask 58368   ;;  %s333_s0 = inlined_call_operand.vmem [shape: f32[36,8], index: 0, kind: input, shape index: {}]   ;;  %s334_s1 = inlined_call_operand.vmem [shape: bf16[36,8], index: 1, kind: output, shape index: {}]  }
   0x1   :  { %v221_v0 = vld [vmem:[%s333_s0] sm:$0xff]  ;;  %v226_v1 = vld [vmem:[%s333_s0 + $0x10] sm:$0xff]  ;;  %v231_v2 = vld [vmem:[%s333_s0 + $0x8] sm:$0xff] }
   0x2   :  { %v236_v3 = vld [vmem:[%s333_s0 + $0x18] sm:$0xff]  ;;  %v241_v4 = vld [vmem:[%s333_s0 + $0x20] sm:$0xf]  ;;  %v29_v5 = vsel %vm28_vm0, %v221_v0, inf  ;;  %v31_v6 = vsel %vm28_vm0, %v226_v1, inf  ;;  %v30_v7 = vsel %vm28_vm0, %v231_v2, inf }
   0x3   :  { %v32_v8 = vsel %vm28_vm0, %v236_v3, inf  ;;  %v34_v9 = vsel %vm33_vm1, %v241_v4, inf  ;;  %v48_v10 = vsel %vm28_vm0, %v221_v0, -inf  ;;  %v49_v13 = vsel %vm28_vm0, %v231_v2, -inf }
   0x4   :  { %v35_v11 = vmin.f32 %v29_v5, %v34_v9  ;;  %v37_v12 = vmin.f32 %v31_v6, %v32_v8  ;;  %v50_v14 = vsel %vm28_vm0, %v226_v1, -inf  ;;  %v51_v15 = vsel %vm28_vm0, %v236_v3, -inf }
   0x5   :  { %v52_v16 = vsel %vm33_vm1, %v241_v4, -inf  ;;  %v55_v19 = vmax.f32 %v50_v14, %v51_v15  ;;  %vm14_vm2 = vcmp.ne.f32.partialorder %v231_v2, 0.0  ;;  %vm15_vm3 = vcmp.ne.f32.partialorder %v226_v1, 0.0 }
   0x6   :  { %v36_v17 = vmin.f32 %v35_v11, %v30_v7  ;;  %v53_v18 = vmax.f32 %v48_v10, %v52_v16  ;;  %v146_v61 = vsel %vm14_vm2, 1.0, %v207_v60  ;;  %vm13_vm4 = vcmp.ne.f32.partialorder %v221_v0, 0.0 }
   0x7   :  { %vm16_vm7 = vcmp.ne.f32.partialorder %v236_v3, 0.0  ;;  %vm17_vm11 = vcmp.ne.f32.partialorder %v241_v4, 0.0 }
   0x8   :  { %v38_v20 = vmin.f32 %v36_v17, %v37_v12  ;;  %v54_v21 = vmax.f32 %v53_v18, %v49_v13 }
   0xa   :  { %39 = vmin.xlane.f32.xlu0 %v38_v20  ;;  %v56_v22 = vmax.f32 %v54_v21, %v55_v19 }
   0xe   :  { %57 = vmax.xlane.f32.xlu0 %v56_v22 }
  0x93   :  { %v40_v23 = vpop.xlane.xlu0 %39 }
  0x94   :  { %v41_v24 = vrot.slane %v40_v23, 4 }
  0x96   :  { %v42_v25 = vmin.f32 %v40_v23, %v41_v24 }
  0x97   :  { %v58_v26 = vpop.xlane.xlu0 %57 }
  0x98   :  { %v43_v27 = vrot.slane %v42_v25, 2  ;;  %v59_v28 = vrot.slane %v58_v26, 4 }
  0x9a   :  { %v60_v29 = vmax.f32 %v58_v26, %v59_v28  ;;  %v44_v30 = vmin.f32 %v42_v25, %v43_v27 }
  0x9c   :  { %v61_v31 = vrot.slane %v60_v29, 2  ;;  %v45_v32 = vrot.slane %v44_v30, 1 }
  0x9e   :  { %v62_v33 = vmax.f32 %v60_v29, %v61_v31  ;;  %v46_v34 = vmin.f32 %v44_v30, %v45_v32 }
  0xa0   :  { %160 = vpush %v46_v34  ;;  %v63_v35 = vrot.slane %v62_v33, 1 }
  0xa2   :  { %v64_v36 = vmax.f32 %v62_v33, %v63_v35 }
  0xa4   :  { %162 = vpush %v64_v36  ;;  %v145_v36 = vsel %vm13_vm4, 1.0, %v207_v60 }
  0xd1   :  { %s161_s0 = spop %160 }
  0xd2   :  { %v267_v38 = vstv %s161_s0 }
  0xd3   :  { %v70_v39 = vsub.f32 %v221_v0, %v267_v38  ;;  %v71_v40 = vsub.f32 %v231_v2, %v267_v38  ;;  %v72_v41 = vsub.f32 %v226_v1, %v267_v38  ;;  %v73_v42 = vsub.f32 %v236_v3, %v267_v38 }
  0xd4   :  { %v74_v44 = vsub.f32 %v241_v4, %v267_v38 }
  0xd5   :  { %s163_s16 = spop %162 }
  0xd6   :  { %s263_s17 = ssub.f32 %s163_s16, %s161_s0 }
  0xd8   :  { %p67_p0 = scmp.eq.f32.partialorder %s263_s17, 0.0  ;;  %v98_v35 = vstv %s263_s17 }
  0xda   :  { %s68_s18 = scalar_select %p67_p0, 1.0, %s263_s17 }
  0xdc   :  { %v75_v37 = vstv %s68_s18 }
  0xdd   :  { %205 = vrcp.f32 %v75_v37 }
  0xea   :  { %v206_v43 = vpop.eup %205 }
  0xeb   :  { %v77_v45 = vmul.f32 %v206_v43, %v70_v39  ;;  %v78_v46 = vmul.f32 %v206_v43, %v71_v40  ;;  %v79_v47 = vmul.f32 %v206_v43, %v72_v41  ;;  %v80_v48 = vmul.f32 %v206_v43, %v73_v42 }
  0xec   :  { %v81_v49 = vmul.f32 %v206_v43, %v74_v44  ;;  %v147_v43 = vsel %vm15_vm3, 1.0, %v207_v60 }
  0xed   :  { %v82_v50 = vmul.f32 15.0, %v77_v45  ;;  %v83_v51 = vmul.f32 15.0, %v78_v46  ;;  %v84_v52 = vmul.f32 15.0, %v79_v47  ;;  %v85_v53 = vmul.f32 15.0, %v80_v48 }
  0xee   :  { %v86_v57 = vmul.f32 15.0, %v81_v49 }
  0xef   :  { %v164_v54 = vand.u32 2147483647, %v82_v50  ;;  %v166_v55 = vcvt.f32.s32 %v82_v50  ;;  %v172_v56 = vand.u32 2147483647, %v83_v51  ;;  %v174_v58 = vcvt.f32.s32 %v83_v51 }
  0xf0   :  { %v182_v59 = vcvt.f32.s32 %v84_v52  ;;  %v180_v63 = vand.u32 2147483647, %v84_v52  ;;  %v169_v5 = vand.u32 2147483648, %v82_v50  ;;  %v177_v7 = vand.u32 2147483648, %v83_v51 }
  0xf1   :  { %v167_v62 = vcvt.s32.f32 %v166_v55  ;;  %v175_v6 = vcvt.s32.f32 %v174_v58  ;;  %vm282_vm5 = vcmp.lt.f32.partialorder %v164_v54, 8388608.0  ;;  %vm286_vm6 = vcmp.lt.f32.partialorder %v172_v56, 8388608.0 }
  0xf2   :  { %v183_v8 = vcvt.s32.f32 %v182_v59  ;;  %v190_v11 = vcvt.f32.s32 %v85_v53  ;;  %v185_v14 = vand.u32 2147483648, %v84_v52  ;;  %v198_v15 = vcvt.f32.s32 %v86_v57 }
  0xf3   :  { %v168_v9 = vand.u32 2147483647, %v167_v62  ;;  %v176_v12 = vand.u32 2147483647, %v175_v6  ;;  %vm291_vm8 = vcmp.lt.f32.partialorder %v180_v63, 8388608.0  ;;  %v193_v22 = vand.u32 2147483648, %v85_v53 }
  0xf4   :  { %v184_v13 = vand.u32 2147483647, %v183_v8  ;;  %v188_v18 = vand.u32 2147483647, %v85_v53  ;;  %v191_v19 = vcvt.s32.f32 %v190_v11  ;;  %v199_v23 = vcvt.s32.f32 %v198_v15 }
  0xf5   :  { %v170_v16 = vor.u32 %v169_v5, %v168_v9  ;;  %v178_v20 = vor.u32 %v177_v7, %v176_v12  ;;  %v196_v26 = vand.u32 2147483647, %v86_v57  ;;  %v201_v27 = vand.u32 2147483648, %v86_v57 }
  0xf6   :  { %v186_v21 = vor.u32 %v185_v14, %v184_v13  ;;  %v192_v25 = vand.u32 2147483647, %v191_v19  ;;  %v200_v30 = vand.u32 2147483647, %v199_v23  ;;  %vm189_vm9 = vcmp.lt.f32.partialorder %v188_v18, 8388608.0 }
  0xf7   :  { %v171_v24 = vsel %vm282_vm5, %v170_v16, %v82_v50  ;;  %v179_v28 = vsel %vm286_vm6, %v178_v20, %v83_v51  ;;  %vm197_vm10 = vcmp.lt.f32.partialorder %v196_v26, 8388608.0  ;;  %v148_v51 = vsel %vm16_vm7, 1.0, %v207_v60 }
  0xf8   :  { %v187_v29 = vsel %vm291_vm8, %v186_v21, %v84_v52  ;;  %v93_v31 = vmul.f32 0.06666667, %v171_v24  ;;  %v194_v32 = vor.u32 %v193_v22, %v192_v25  ;;  %v94_v33 = vmul.f32 0.06666667, %v179_v28 }
  0xf9   :  { %v95_v34 = vmul.f32 0.06666667, %v187_v29  ;;  %v202_v37 = vor.u32 %v201_v27, %v200_v30  ;;  %v149_v54 = vsel %vm17_vm11, 1.0, %v207_v60 }
  0xfa   :  { %v99_v39 = vmul.f32 %v98_v35, %v93_v31  ;;  %v195_v40 = vsel %vm189_vm9, %v194_v32, %v85_v53  ;;  %v100_v41 = vmul.f32 %v98_v35, %v94_v33 }
  0xfb   :  { %v101_v42 = vmul.f32 %v98_v35, %v95_v34  ;;  %v203_v44 = vsel %vm197_vm10, %v202_v37, %v86_v57  ;;  %v96_v45 = vmul.f32 0.06666667, %v195_v40 }
  0xfc   :  { %v104_v46 = vadd.f32 %v99_v39, %v267_v38  ;;  %v97_v47 = vmul.f32 0.06666667, %v203_v44  ;;  %v105_v0 = vadd.f32 %v100_v41, %v267_v38 }
  0xfd   :  { %v106_v48 = vadd.f32 %v101_v42, %v267_v38  ;;  %v102_v49 = vmul.f32 %v98_v35, %v96_v45 }
  0xfe   :  { %v109_v50 = vmul.f32 %v145_v36, %v104_v46  ;;  %v103_v52 = vmul.f32 %v98_v35, %v97_v47  ;;  %v110_v53 = vmul.f32 %v146_v61, %v105_v0 }
  0xff   :  { %v111_v1 = vmul.f32 %v147_v43, %v106_v48  ;;  %v107_v55 = vadd.f32 %v102_v49, %v267_v38 }
 0x100   :  { %v155_v56 = vpack.c.bf16 %v109_v50, %v109_v50  ;;  %v108_v57 = vadd.f32 %v103_v52, %v267_v38  ;;  %v156_v4 = vpack.c.bf16 %v110_v53, %v110_v53 }
 0x101   :  { %v157_v58 = vpack.c.bf16 %v111_v1, %v111_v1  ;;  %v112_v59 = vmul.f32 %v148_v51, %v107_v55 }
 0x102   :  { %135 = vst.msk [vmem:[%s334_s1] sm:$0xf] %vm33_vm1, %v155_v56  ;;  %v113_v62 = vmul.f32 %v149_v54, %v108_v57  ;;  %136 = vst.msk [vmem:[%s334_s1 + $0x4] sm:$0xf] %vm33_vm1, %v156_v4 }
 0x103   :  { %137 = vst.msk [vmem:[%s334_s1 + $0x8] sm:$0xf] %vm33_vm1, %v157_v58  ;;  %v158_v3 = vpack.c.bf16 %v112_v59, %v112_v59 }
 0x104   :  { %v159_v38 = vpack.c.bf16 %v113_v62, %v113_v62 }
 0x105   :  { %138 = vst.msk [vmem:[%s334_s1 + $0xc] sm:$0xf] %vm33_vm1, %v158_v3 }
 0x106   :  { %140 = vst.msk [vmem:[%s334_s1 + $0x10] sm:$0x3] %vm139_vm12, %v159_v38 }

</bundles_post_ra>
